<compile_context>
chip_gen: v7x
topology: tpu7x:2x2x1
jax: 0.10.0
libtpu: 0.0.40
codegen_flags: <defaults>
</compile_context>

<pallas_src>
import functools

import jax
import jax.numpy as jnp
from jax.experimental import pallas as pl
from jax.experimental.pallas import tpu as pltpu


def _choose_d_tile(n, d_eff):
    """Channel tile: multiple of 128 dividing d_eff (VMEM-budgeted), else full."""
    if d_eff % 128 != 0:
        return d_eff
    budget = 12 * 1024 * 1024  # keep per-step blocks well under scoped VMEM
    for cand in (512, 384, 256, 128):
        if d_eff % cand == 0 and (6 * n + 128) * cand * 4 <= budget:
            return cand
    return 128


def _choose_ti(n, d_tile):
    """Output-row chunk: multiple of 8 dividing n, acc kept to ~8 vregs."""
    if n % 8 != 0:
        # TODO(synk): odd sequence lengths fall back to a single unchunked tile.
        return n
    max_ti = max(8, (8192 // max(d_tile, 1)) // 8 * 8)
    ti = min(n, max_ti)
    while n % ti:
        ti -= 8
    return max(ti, 8)


def _tno_kernel(tpad_ref, x_ref, o_ref, *, n, ti, u):
    """One (d-tile, batch, seq-chunk) step.

    tpad_ref: (2n, dt)  zero-padded shared filter (rows [0,n) are zero)
    x_ref:    (1, n, dt) one batch element, all sequence positions
    o_ref:    (1, ti, dt) output rows [i0, i0+ti)
    """
    ii = pl.program_id(2)
    i0 = ii * ti
    dt = o_ref.shape[-1]

    def body(c, acc):
        k0 = c * u
        for dk in range(u):  # static partial unroll (LLO visibility)
            k = k0 + dk
            # Causal Toeplitz rows for this chunk & shift k:
            #   t_k[r] = t[i0 + r - k] if i0 + r >= k else 0
            t_k = tpad_ref[pl.ds(n + i0 - k, ti), :]      # (ti, dt)
            x_k = x_ref[0, pl.ds(k, 1), :]                # (1, dt) row k of x
            acc = acc + t_k * x_k                         # 2 VPU ops per element
        return acc

    # Causality: only shifts k < i0 + ti contribute to this output chunk.
    n_sub = (ii + 1) * (ti // u)
    acc = jax.lax.fori_loop(0, n_sub, body, jnp.zeros((ti, dt), jnp.float32))
    o_ref[0] = acc.astype(o_ref.dtype)


def tno_causal(x, t):
    """x: (b, n, d), t: (n, d)  ->  y: (b, n, d) with y[b,i,c]=sum_{j<=i} t[i-j,c]*x[b,j,c]."""
    b, n, d = x.shape
    assert t.shape == (n, d)

    # ---- lane folding: when d < 128, fold power-of-2 batch groups into lanes ----
    g = 1
    while d * g * 2 <= 128 and b % (g * 2) == 0:
        g *= 2
    if g > 1:
        x_f = x.reshape(b // g, g, n, d).transpose(0, 2, 1, 3).reshape(b // g, n, g * d)
        t_f = jnp.tile(t, (1, g))
    else:
        x_f, t_f = x, t
    bf, _, df = x_f.shape

    # Zero-padded shared filter: t_pad[n + m] = t[m], t_pad[:n] = 0.
    t_pad = jnp.concatenate([jnp.zeros_like(t_f), t_f], axis=0)  # (2n, df)

    d_tile = _choose_d_tile(n, df)
    ti = _choose_ti(n, d_tile)
    u = 8 if ti % 8 == 0 else (4 if ti % 4 == 0 else (2 if ti % 2 == 0 else 1))

    assert df % d_tile == 0 and n % ti == 0 and ti % u == 0
    grid = (df // d_tile, bf, n // ti)

    vmem_need = 4 * d_tile * (2 * (2 * n) + 2 * n + 2 * ti) + (4 << 20)
    vmem_limit = int(min(max(vmem_need, 32 << 20), 64 << 20))

    kernel = functools.partial(_tno_kernel, n=n, ti=ti, u=u)
    y_f = pl.pallas_call(
        kernel,
        out_shape=jax.ShapeDtypeStruct((bf, n, df), x.dtype),
        grid=grid,
        in_specs=[
            # Shared padded filter: re-DMAs only when the d-tile changes.
            pl.BlockSpec((2 * n, d_tile), lambda di, bi, ii: (0, di)),
            # One batch element, all rows: resident across the seq-chunk axis.
            pl.BlockSpec((1, n, d_tile), lambda di, bi, ii: (bi, 0, di)),
        ],
        out_specs=pl.BlockSpec((1, ti, d_tile), lambda di, bi, ii: (bi, ii, di)),
        compiler_params=pltpu.CompilerParams(
            dimension_semantics=("parallel", "parallel", "parallel"),
            vmem_limit_bytes=vmem_limit,
        ),
    )(t_pad, x_f)

    if g > 1:
        y = y_f.reshape(b // g, n, g, d).transpose(0, 2, 1, 3).reshape(b, n, d)
    else:
        y = y_f
    return y


def _tno_causal_ref(x, t):
    """Pure-JAX reference for verification."""
    b, n, d = x.shape
    idx = jnp.arange(n)[:, None] - jnp.arange(n)[None, :]  # i - j
    mask = (idx >= 0)[..., None]                            # (n, n, 1)
    tmat = jnp.where(mask, t[jnp.clip(idx, 0), :], 0.0)     # (n, n, d)
    return jnp.einsum("ijd,bjd->bid", tmat, x)


def _check(b, n, d, seed):
    kx, kt = jax.random.split(jax.random.PRNGKey(seed))
    x = jax.random.normal(kx, (b, n, d), dtype=jnp.float32)
    t = jax.random.normal(kt, (n, d), dtype=jnp.float32)
    y = jax.block_until_ready(tno_causal(x, t))
    y_ref = _tno_causal_ref(x, t)
    assert y.shape == (b, n, d)
    assert jnp.allclose(y, y_ref, atol=1e-4, rtol=1e-4), f"mismatch at {(b, n, d)}"


if __name__ == "__main__":
    # Small shapes implied by the module's forward: x (b, n, d), t (n, d).
    _check(b=2, n=8, d=32, seed=0)
    # Slightly larger shape to exercise lane folding, d-tiling and multi-chunk
    # causal accumulation paths.
    _check(b=4, n=128, d=32, seed=1)
    print("KERNEL_OK")
</pallas_src>

<mosaic_0001>
module attributes {stable_mosaic.version = 11 : i64} {
  func.func @_tno_kernel(%arg0: i32, %arg1: i32, %arg2: i32, %arg3: memref<16x64xf32, #tpu.memory_space<vmem>>, %arg4: memref<1x8x64xf32, #tpu.memory_space<vmem>>, %arg5: memref<1x8x64xf32, #tpu.memory_space<vmem>>) attributes {dimension_semantics = [#tpu.dimension_semantics<parallel>, #tpu.dimension_semantics<parallel>, #tpu.dimension_semantics<parallel>], iteration_bounds = array<i64: 1, 1, 1>, scalar_prefetch = 0 : i64, scratch_operands = 0 : i64, tpu.core_type = #tpu.core_type<tc>, window_params = [{transform_indices = @transform_0, window_bounds = array<i64: 16, 64>}, {transform_indices = @transform_1, window_bounds = array<i64: 1, 8, 64>}, {transform_indices = @transform_2, window_bounds = array<i64: 1, 8, 64>}]} {
    %c8_i32 = arith.constant 8 : i32
    %0 = arith.muli %arg2, %c8_i32 : i32
    %c1_i32 = arith.constant 1 : i32
    %1 = arith.addi %arg2, %c1_i32 : i32
    %c1_i32_0 = arith.constant 1 : i32
    %2 = arith.muli %1, %c1_i32_0 : i32
    %cst = arith.constant 0.000000e+00 : f32
    %3 = vector.broadcast %cst : f32 to vector<8x64xf32>
    %c0_i32 = arith.constant 0 : i32
    %4 = arith.subi %2, %c0_i32 : i32
    %5 = arith.addi %c0_i32, %4 : i32
    %c1_i32_1 = arith.constant 1 : i32
    %6 = scf.for %arg6 = %c0_i32 to %5 step %c1_i32_1 iter_args(%arg7 = %3) -> (vector<8x64xf32>)  : i32 {
      %c8_i32_4 = arith.constant 8 : i32
      %10 = arith.muli %arg6, %c8_i32_4 : i32
      %c0_i32_5 = arith.constant 0 : i32
      %11 = arith.addi %10, %c0_i32_5 : i32
      %c8_i32_6 = arith.constant 8 : i32
      %12 = arith.addi %c8_i32_6, %0 : i32
      %13 = arith.subi %12, %11 : i32
      %14 = arith.index_cast %13 : i32 to index
      %c0_7 = arith.constant 0 : index
      %15 = vector.load %arg3[%14, %c0_7] : memref<16x64xf32, #tpu.memory_space<vmem>>, vector<8x64xf32>
      %c0_8 = arith.constant 0 : index
      %16 = arith.index_cast %11 : i32 to index
      %c0_9 = arith.constant 0 : index
      %17 = vector.load %arg4[%c0_8, %16, %c0_9] : memref<1x8x64xf32, #tpu.memory_space<vmem>>, vector<1x1x64xf32>
      %18 = vector.shape_cast %17 : vector<1x1x64xf32> to vector<1x64xf32>
      %19 = vector.broadcast %18 : vector<1x64xf32> to vector<8x64xf32>
      %20 = arith.mulf %15, %19 : vector<8x64xf32>
      %21 = arith.addf %arg7, %20 : vector<8x64xf32>
      %c1_i32_10 = arith.constant 1 : i32
      %22 = arith.addi %10, %c1_i32_10 : i32
      %c8_i32_11 = arith.constant 8 : i32
      %23 = arith.addi %c8_i32_11, %0 : i32
      %24 = arith.subi %23, %22 : i32
      %25 = arith.index_cast %24 : i32 to index
      %c0_12 = arith.constant 0 : index
      %26 = vector.load %arg3[%25, %c0_12] : memref<16x64xf32, #tpu.memory_space<vmem>>, vector<8x64xf32>
      %c0_13 = arith.constant 0 : index
      %27 = arith.index_cast %22 : i32 to index
      %c0_14 = arith.constant 0 : index
      %28 = vector.load %arg4[%c0_13, %27, %c0_14] : memref<1x8x64xf32, #tpu.memory_space<vmem>>, vector<1x1x64xf32>
      %29 = vector.shape_cast %28 : vector<1x1x64xf32> to vector<1x64xf32>
      %30 = vector.broadcast %29 : vector<1x64xf32> to vector<8x64xf32>
      %31 = arith.mulf %26, %30 : vector<8x64xf32>
      %32 = arith.addf %21, %31 : vector<8x64xf32>
      %c2_i32 = arith.constant 2 : i32
      %33 = arith.addi %10, %c2_i32 : i32
      %c8_i32_15 = arith.constant 8 : i32
      %34 = arith.addi %c8_i32_15, %0 : i32
      %35 = arith.subi %34, %33 : i32
      %36 = arith.index_cast %35 : i32 to index
      %c0_16 = arith.constant 0 : index
      %37 = vector.load %arg3[%36, %c0_16] : memref<16x64xf32, #tpu.memory_space<vmem>>, vector<8x64xf32>
      %c0_17 = arith.constant 0 : index
      %38 = arith.index_cast %33 : i32 to index
      %c0_18 = arith.constant 0 : index
      %39 = vector.load %arg4[%c0_17, %38, %c0_18] : memref<1x8x64xf32, #tpu.memory_space<vmem>>, vector<1x1x64xf32>
      %40 = vector.shape_cast %39 : vector<1x1x64xf32> to vector<1x64xf32>
      %41 = vector.broadcast %40 : vector<1x64xf32> to vector<8x64xf32>
      %42 = arith.mulf %37, %41 : vector<8x64xf32>
      %43 = arith.addf %32, %42 : vector<8x64xf32>
      %c3_i32 = arith.constant 3 : i32
      %44 = arith.addi %10, %c3_i32 : i32
      %c8_i32_19 = arith.constant 8 : i32
      %45 = arith.addi %c8_i32_19, %0 : i32
      %46 = arith.subi %45, %44 : i32
      %47 = arith.index_cast %46 : i32 to index
      %c0_20 = arith.constant 0 : index
      %48 = vector.load %arg3[%47, %c0_20] : memref<16x64xf32, #tpu.memory_space<vmem>>, vector<8x64xf32>
      %c0_21 = arith.constant 0 : index
      %49 = arith.index_cast %44 : i32 to index
      %c0_22 = arith.constant 0 : index
      %50 = vector.load %arg4[%c0_21, %49, %c0_22] : memref<1x8x64xf32, #tpu.memory_space<vmem>>, vector<1x1x64xf32>
      %51 = vector.shape_cast %50 : vector<1x1x64xf32> to vector<1x64xf32>
      %52 = vector.broadcast %51 : vector<1x64xf32> to vector<8x64xf32>
      %53 = arith.mulf %48, %52 : vector<8x64xf32>
      %54 = arith.addf %43, %53 : vector<8x64xf32>
      %c4_i32 = arith.constant 4 : i32
      %55 = arith.addi %10, %c4_i32 : i32
      %c8_i32_23 = arith.constant 8 : i32
      %56 = arith.addi %c8_i32_23, %0 : i32
      %57 = arith.subi %56, %55 : i32
      %58 = arith.index_cast %57 : i32 to index
      %c0_24 = arith.constant 0 : index
      %59 = vector.load %arg3[%58, %c0_24] : memref<16x64xf32, #tpu.memory_space<vmem>>, vector<8x64xf32>
      %c0_25 = arith.constant 0 : index
      %60 = arith.index_cast %55 : i32 to index
      %c0_26 = arith.constant 0 : index
      %61 = vector.load %arg4[%c0_25, %60, %c0_26] : memref<1x8x64xf32, #tpu.memory_space<vmem>>, vector<1x1x64xf32>
      %62 = vector.shape_cast %61 : vector<1x1x64xf32> to vector<1x64xf32>
      %63 = vector.broadcast %62 : vector<1x64xf32> to vector<8x64xf32>
      %64 = arith.mulf %59, %63 : vector<8x64xf32>
      %65 = arith.addf %54, %64 : vector<8x64xf32>
      %c5_i32 = arith.constant 5 : i32
      %66 = arith.addi %10, %c5_i32 : i32
      %c8_i32_27 = arith.constant 8 : i32
      %67 = arith.addi %c8_i32_27, %0 : i32
      %68 = arith.subi %67, %66 : i32
      %69 = arith.index_cast %68 : i32 to index
      %c0_28 = arith.constant 0 : index
      %70 = vector.load %arg3[%69, %c0_28] : memref<16x64xf32, #tpu.memory_space<vmem>>, vector<8x64xf32>
      %c0_29 = arith.constant 0 : index
      %71 = arith.index_cast %66 : i32 to index
      %c0_30 = arith.constant 0 : index
      %72 = vector.load %arg4[%c0_29, %71, %c0_30] : memref<1x8x64xf32, #tpu.memory_space<vmem>>, vector<1x1x64xf32>
      %73 = vector.shape_cast %72 : vector<1x1x64xf32> to vector<1x64xf32>
      %74 = vector.broadcast %73 : vector<1x64xf32> to vector<8x64xf32>
      %75 = arith.mulf %70, %74 : vector<8x64xf32>
      %76 = arith.addf %65, %75 : vector<8x64xf32>
      %c6_i32 = arith.constant 6 : i32
      %77 = arith.addi %10, %c6_i32 : i32
      %c8_i32_31 = arith.constant 8 : i32
      %78 = arith.addi %c8_i32_31, %0 : i32
      %79 = arith.subi %78, %77 : i32
      %80 = arith.index_cast %79 : i32 to index
      %c0_32 = arith.constant 0 : index
      %81 = vector.load %arg3[%80, %c0_32] : memref<16x64xf32, #tpu.memory_space<vmem>>, vector<8x64xf32>
      %c0_33 = arith.constant 0 : index
      %82 = arith.index_cast %77 : i32 to index
      %c0_34 = arith.constant 0 : index
      %83 = vector.load %arg4[%c0_33, %82, %c0_34] : memref<1x8x64xf32, #tpu.memory_space<vmem>>, vector<1x1x64xf32>
      %84 = vector.shape_cast %83 : vector<1x1x64xf32> to vector<1x64xf32>
      %85 = vector.broadcast %84 : vector<1x64xf32> to vector<8x64xf32>
      %86 = arith.mulf %81, %85 : vector<8x64xf32>
      %87 = arith.addf %76, %86 : vector<8x64xf32>
      %c7_i32 = arith.constant 7 : i32
      %88 = arith.addi %10, %c7_i32 : i32
      %c8_i32_35 = arith.constant 8 : i32
      %89 = arith.addi %c8_i32_35, %0 : i32
      %90 = arith.subi %89, %88 : i32
      %91 = arith.index_cast %90 : i32 to index
      %c0_36 = arith.constant 0 : index
      %92 = vector.load %arg3[%91, %c0_36] : memref<16x64xf32, #tpu.memory_space<vmem>>, vector<8x64xf32>
      %c0_37 = arith.constant 0 : index
      %93 = arith.index_cast %88 : i32 to index
      %c0_38 = arith.constant 0 : index
      %94 = vector.load %arg4[%c0_37, %93, %c0_38] : memref<1x8x64xf32, #tpu.memory_space<vmem>>, vector<1x1x64xf32>
      %95 = vector.shape_cast %94 : vector<1x1x64xf32> to vector<1x64xf32>
      %96 = vector.broadcast %95 : vector<1x64xf32> to vector<8x64xf32>
      %97 = arith.mulf %92, %96 : vector<8x64xf32>
      %98 = arith.addf %87, %97 : vector<8x64xf32>
      scf.yield %98 : vector<8x64xf32>
    }
    %c0 = arith.constant 0 : index
    %c0_2 = arith.constant 0 : index
    %c0_3 = arith.constant 0 : index
    %7 = vector.load %arg5[%c0, %c0_2, %c0_3] : memref<1x8x64xf32, #tpu.memory_space<vmem>>, vector<1x8x64xf32>
    %8 = vector.shape_cast %7 : vector<1x8x64xf32> to vector<8x64xf32>
    %9 = vector.shape_cast %6 : vector<8x64xf32> to vector<1x8x64xf32>
    tpu.vector_store %arg5[%c0, %c0_2, %c0_3], %9 {strides = array<i32>} : memref<1x8x64xf32, #tpu.memory_space<vmem>>, vector<1x8x64xf32>,
    return
  }
  func.func @transform_0(%arg0: i32, %arg1: i32, %arg2: i32) -> (i32, i32) {
    %c0_i32 = arith.constant 0 : i32
    %c0_i32_0 = arith.constant 0 : i32
    return %c0_i32, %arg0 : i32, i32
  }
  func.func @transform_1(%arg0: i32, %arg1: i32, %arg2: i32) -> (i32, i32, i32) {
    %c0_i32 = arith.constant 0 : i32
    %c0_i32_0 = arith.constant 0 : i32
    return %arg1, %c0_i32, %arg0 : i32, i32, i32
  }
  func.func @transform_2(%arg0: i32, %arg1: i32, %arg2: i32) -> (i32, i32, i32) {
    %c0_i32 = arith.constant 0 : i32
    return %arg1, %arg2, %arg0 : i32, i32, i32
  }
}

</mosaic_0001>

<bundles_post_ra>
// kernel: tpu_custom_call.1
= control target key start
LH: loop header
LB: loop body
LE: loop exit
PB: predicated region body
PF: predicated region fallthrough
CT: control target
= control target key end

     0   :  { %7 = vsyncpa [#allocation3], 0  ;;  %s424_s0 = inlined_call_operand.hbm [shape: f32[16,64], index: 0, kind: input, shape index: {}]   ;;  %s425_s1 = inlined_call_operand.hbm [shape: f32[1,8,64], index: 1, kind: input, shape index: {}]   ;;  %s426_s2 = inlined_call_operand.hbm [shape: f32[1,8,64], index: 2, kind: output, shape index: {}]  }
   0x1   :  { %8 = vsyncpa [#allocation6], 0 }
   0x2   :  { %9 = vsyncpa [#allocation4], 0  ;;  %s333_s9 = smov [#allocation2]   ;;  %s245_s13 = scalar_lea.hbm %s424_s0, 256 }
   0x3   :  { %s15_s10 = sshll.u32 %s333_s9, 4  ;;  %p246_p0 = scmp.ne.s32.totalorder %s424_s0, %s245_s13  ;;  %s16_s10 = int_to_ptr.vmem [resolvable:$true] %s15_s10 }
   0x4   :  { %p249_p1 = scmp.lt.u32.totalorder %s245_s13, %s424_s0 }
   0x6   :  { %p251_p2 = pnand %p249_p1, %p246_p0 }
   0x8   :  { %254 = shalt.err (!%p251_p2)
}
   0x9   :  { %s255_s18 = scalar_lea.vmem %s16_s10, 256  ;;  %p260_p4 = scmp.lt.s32.totalorder %s16_s10, %s16_s10 }
   0xa   :  { %p256_p3 = scmp.ne.s32.totalorder %s16_s10, %s255_s18  ;;  %p261_p5 = scmp.lt.s32.totalorder %s255_s18, %s255_s18 }
   0xc   :  { %p262_p6 = por %p261_p5, %p260_p4 }
   0xe   :  { %p263_p7 = pnand %p262_p6, %p256_p3 }
  0x10   :  { %266 = shalt.err (!%p263_p7)
}
  0x11   :  { %s334_s19 = smov 128   ;;  %s335_s20 = smov 8  }
  0x12   :  { %21 = dma.hbm_to_vmem [thread:$0]  %s424_s0, 256, %s16_s10, [#allocation3], %s334_s19, %s334_s19, %s335_s20  }
  0x13   :  { %s336_s23 = smov [#allocation5]   ;;  %s267_s27 = scalar_lea.hbm %s425_s1, 128 }
  0x14   :  { %s28_s24 = sshll.u32 %s336_s23, 4  ;;  %p268_p8 = scmp.ne.s32.totalorder %s425_s1, %s267_s27  ;;  %s29_s24 = int_to_ptr.vmem [resolvable:$true] %s28_s24 }
  0x15   :  { %p271_p9 = scmp.lt.u32.totalorder %s267_s27, %s425_s1 }
  0x17   :  { %p273_p10 = pnand %p271_p9, %p268_p8 }
  0x19   :  { %276 = shalt.err (!%p273_p10)
}
  0x1a   :  { %s277_s4 = scalar_lea.vmem %s29_s24, 128  ;;  %p282_p12 = scmp.lt.s32.totalorder %s29_s24, %s29_s24 }
  0x1b   :  { %p278_p11 = scmp.ne.s32.totalorder %s29_s24, %s277_s4  ;;  %p283_p13 = scmp.lt.s32.totalorder %s277_s4, %s277_s4 }
  0x1d   :  { %p284_p0 = por %p283_p13, %p282_p12 }
  0x1f   :  { %p285_p1 = pnand %p284_p0, %p278_p11 }
  0x21   :  { %288 = shalt.err (!%p285_p1)
}
  0x22   :  { %31 = dma.hbm_to_vmem [thread:$0]  %s425_s1, 128, %s29_s24, [#allocation6]  }
  0x23   :  { %319 = dma.done.wait [#allocation3], 256  }
  0x24   :  { %320 = vsyncadd [#allocation3], 4294967040 }
  0x25   :  { %321 = dma.done.wait [#allocation6], 128  }
  0x26   :  { %322 = vsyncadd [#allocation6], 4294967168  ;;  %v377_v0 = vmov 0.0   ;;  %s379_s6 = smov 0  }
  0x27 LB: > { %s386_s7 = sshll.u32 %s331_s6, 3  ;;  %s43_s6 = sadd.s32 1, %s331_s6   ;;  %s331_s6 = sphi %s379_s6, %s43_s6   ;;  %v327_v0 = vphi %v377_v0, %v427_v0  }
  0x28   : > { %s49_s1 = ssub.s32 8, %s386_s7  ;;  %s390_s8 = scalar_lea.vmem [#allocation5], %s386_s7 }
  0x29   : > { %v202_v1 = vld [vmem:[%s390_s8] ss:$0 sm:$0xff]  ;;  %s60_s9 = sadd.s32 1, %s386_s7  ;;  %s50_s10 = scalar_lea.vmem [#allocation2], %s49_s1  ;;  %v205_v3 = vld [vmem:[%s390_s8 + $0x1] ss:$0 sm:$0xff] }
  0x2a   : > { %v51_v2 = vld [vmem:[%s50_s10] sm:$0xff]  ;;  %s61_s11 = ssub.s32 8, %s60_s9  ;;  %s72_s12 = sadd.s32 2, %s386_s7 }
  0x2b   : > { %v58_v4 = vmul.f32 %v202_v1, %v51_v2  ;;  %s73_s13 = ssub.s32 8, %s72_s12  ;;  %v208_v5 = vld [vmem:[%s390_s8 + $0x2] ss:$0 sm:$0xff]  ;;  %s62_s14 = scalar_lea.vmem [#allocation2], %s61_s11  ;;  %v211_v10 = vld [vmem:[%s390_s8 + $0x3] ss:$0 sm:$0xff] }
  0x2c   : > { %v63_v6 = vld [vmem:[%s62_s14] sm:$0xff]  ;;  %s84_s15 = sadd.s32 3, %s386_s7  ;;  %s74_s16 = scalar_lea.vmem [#allocation2], %s73_s13 }
  0x2d   : > { %v59_v7 = vadd.f32 %v327_v0, %v58_v4  ;;  %v70_v8 = vmul.f32 %v205_v3, %v63_v6  ;;  %v75_v9 = vld [vmem:[%s74_s16] sm:$0xff]  ;;  %s85_s17 = ssub.s32 8, %s84_s15  ;;  %s96_s18 = sadd.s32 4, %s386_s7 }
  0x2e   : > { %v82_v11 = vmul.f32 %v208_v5, %v75_v9  ;;  %s97_s19 = ssub.s32 8, %s96_s18  ;;  %v214_v12 = vld [vmem:[%s390_s8 + $0x4] ss:$0 sm:$0xff]  ;;  %s86_s20 = scalar_lea.vmem [#allocation2], %s85_s17  ;;  %v217_v17 = vld [vmem:[%s390_s8 + $0x5] ss:$0 sm:$0xff] }
  0x2f   : > { %v71_v13 = vadd.f32 %v70_v8, %v59_v7  ;;  %v87_v14 = vld [vmem:[%s86_s20] sm:$0xff]  ;;  %s108_s21 = sadd.s32 5, %s386_s7  ;;  %s98_s22 = scalar_lea.vmem [#allocation2], %s97_s19 }
  0x30   : > { %v94_v15 = vmul.f32 %v211_v10, %v87_v14  ;;  %v99_v16 = vld [vmem:[%s98_s22] sm:$0xff]  ;;  %s109_s23 = ssub.s32 8, %s108_s21  ;;  %s120_s24 = sadd.s32 6, %s386_s7 }
  0x31   : > { %v83_v18 = vadd.f32 %v82_v11, %v71_v13  ;;  %v106_v19 = vmul.f32 %v214_v12, %v99_v16  ;;  %s121_s25 = ssub.s32 8, %s120_s24  ;;  %s110_s26 = scalar_lea.vmem [#allocation2], %s109_s23  ;;  %v220_v21 = vld [vmem:[%s390_s8 + $0x6] ss:$0 sm:$0xff]  ;;  %v223_v25 = vld [vmem:[%s390_s8 + $0x7] ss:$0 sm:$0xff] }
  0x32   : > { %v111_v20 = vld [vmem:[%s110_s26] sm:$0xff]  ;;  %s132_s27 = sadd.s32 7, %s386_s7  ;;  %s122_s28 = scalar_lea.vmem [#allocation2], %s121_s25 }
  0x33   : > { %v95_v22 = vadd.f32 %v94_v15, %v83_v18  ;;  %v118_v23 = vmul.f32 %v217_v17, %v111_v20  ;;  %v123_v24 = vld [vmem:[%s122_s28] sm:$0xff]  ;;  %s133_s29 = ssub.s32 8, %s132_s27  ;;  %p42_p2 = scmp.ge.s32.totalorder %s43_s6, 1 }
  0x34   : > { %v130_v27 = vmul.f32 %v220_v21, %v123_v24  ;;  %s134_s30 = scalar_lea.vmem [#allocation2], %s133_s29  ;;  %vm144_vm0 = vcmask (%p42_p2), 523264   ;;  %s337_s3 = smov (%p42_p2), [#allocation7]  }
  0x35   : > { %v107_v26 = vadd.f32 %v106_v19, %v95_v22  ;;  %v135_v28 = vld [vmem:[%s134_s30] sm:$0xff]  ;;  %s152_s4 = sshll.u32 (%p42_p2), %s337_s3, 4  ;;  %s153_s4 = int_to_ptr.vmem [resolvable:$true] %s152_s4 }
  0x36   : > { %v142_v30 = vmul.f32 %v223_v25, %v135_v28  ;;  %s289_s0 = scalar_lea.vmem (%p42_p2), %s153_s4, 128  ;;  %p294_p4 = scmp.lt.s32.totalorder (%p42_p2), %s153_s4, %s153_s4 }
  0x37   : > { %v119_v29 = vadd.f32 %v118_v23, %v107_v26  ;;  %45 = sbr.rel (!%p42_p2) target bundleno = 39 (0x27), region = 59  ;;  %p290_p3 = scmp.ne.s32.totalorder (%p42_p2), %s153_s4, %s289_s0 }
  0x38   :  { %p295_p5 = scmp.lt.s32.totalorder (%p42_p2), %s289_s0, %s289_s0 }
  0x39   : > { %v131_v31 = vadd.f32 %v130_v27, %v119_v29 }
  0x3a   :  { %p296_p6 = por (%p42_p2), %p295_p5, %p294_p4 }
  0x3b   : > { %v143_v32 = vadd.f32 %v142_v30, %v131_v31  }
  0x3c   :  { %p297_p7 = pnand (%p42_p2), %p296_p6, %p290_p3 }
  0x3d   : > { %v427_v0 = vmov %v143_v32  ;;  %145 = vst.msk [vmem:[#allocation7] sm:$0xff] (%p42_p2), %vm144_vm0, %v143_v32 }
  0x3e   :  { %300 = shalt.err (!%p297_p7)
}
  0x3f   :  { %s301_s1 = scalar_lea.hbm %s426_s2, 128 }
  0x40   :  { %p302_p8 = scmp.ne.s32.totalorder %s426_s2, %s301_s1  ;;  %p305_p9 = scmp.lt.u32.totalorder %s301_s1, %s426_s2 }
  0x42   :  { %p307_p10 = pnand %p305_p9, %p302_p8 }
  0x44   :  { %310 = shalt.err (!%p307_p10)
}
  0x45   :  { %155 = dma.vmem_to_hbm [thread:$0]  %s153_s4, 128, %s426_s2, [#allocation4]  }
  0x46   :  { %323 = dma.done.wait [#allocation4], 128  }
  0x47   :  { %324 = vsyncadd [#allocation4], 4294967168 }
  0x48   :  { %159 = vsyncpa [#allocation3], 1 }
  0x49   :  { %160 = vsyncpa [#allocation6], 1 }
  0x4a   :  { %161 = vsyncpa [#allocation4], 1 }

</bundles_post_ra>
